<compile_context>
chip_gen: v7x
topology: tpu7x:2x2x1
jax: 0.10.0
libtpu: 0.0.40
codegen_flags: <defaults>
</compile_context>

<pallas_src>
import jax
import jax.numpy as jnp
from jax.experimental import pallas as pl
from jax.experimental.pallas import tpu as pltpu


_TARGET_BLOCK_BYTES = 8 * 1024 * 1024     # ~8 MiB of HBM traffic per logits block
_DEFAULT_VMEM_CAP = 64 * 1024 * 1024      # conservative fallback (v7x per-TC)


def _vmem_capacity_bytes():
    """Per-TensorCore VMEM capacity; conservative fallback if query fails."""
    try:
        info = pltpu.get_tpu_info()
        cap = int(getattr(info, "vmem_capacity_bytes", 0) or 0)
        if cap > 0:
            return cap
    except Exception:
        pass
    return _DEFAULT_VMEM_CAP


def _num_tensorcores():
    """2 TensorCores per chip on v7x; 1 on v5e/v6e (and as a safe default)."""
    try:
        kind = jax.devices()[0].device_kind.lower()
    except Exception:
        kind = ""
    return 2 if "v7" in kind else 1


def _pick_tile_n(n, c, itemsize, vmem_budget):
    """Bytes-driven row tile: ~_TARGET_BLOCK_BYTES of HBM per block, multiple of
    8 rows, with double-buffered input + f32 working set inside vmem_budget."""
    hbm_row = c * itemsize                         # true HBM bytes per row
    c_pad = -(-c // 128) * 128                     # VMEM lane padding
    # 2 pipelined input buffers + ~3 f32 (tile_n, C) intermediates + accumulator
    vmem_row = 2 * c_pad * itemsize + 3 * c_pad * 4 + 512
    max_rows = max(8, vmem_budget // vmem_row)
    target_rows = max(8, _TARGET_BLOCK_BYTES // hbm_row)
    tile = min(max_rows, target_rows)
    tile = max(8, (tile // 8) * 8)
    if n <= tile:
        return n                                   # single (possibly ragged) full-dim tile
    return tile


def _make_kernel(n_rows, tile_n, n_classes, tiles_per_split):
    def kernel(logits_ref, tgt_ref, out_ref, acc_ref):
        s = pl.program_id(0)
        t = pl.program_id(1)
        nt = pl.num_programs(1)

        @pl.when(t == 0)
        def _init():
            acc_ref[...] = jnp.zeros_like(acc_ref)

        x = logits_ref[...].astype(jnp.float32)              # (tile_n, C) f32
        tgt = tgt_ref[...]                                    # (tile_n, 1) int32

        # Numerically stable per-row cross entropy: lse(x) - x[target].
        # The target gather is a fused select-reduce (no materialized one-hot).
        classes = jax.lax.broadcasted_iota(jnp.int32, (tile_n, n_classes), 1)
        m = jnp.max(x, axis=-1, keepdims=True)
        lse = m + jnp.log(jnp.sum(jnp.exp(x - m), axis=-1, keepdims=True))
        tgt_logit = jnp.sum(jnp.where(classes == tgt, x, 0.0),
                            axis=-1, keepdims=True)
        ce = lse - tgt_logit                                  # (tile_n, 1)

        # Only edge tiles (ragged last tile / clamped duplicate tiles) pay for
        # the row-validity mask; interior tiles take the cheap path.  The mask
        # uses the *unclamped* global tile index so duplicate tiles contribute 0.
        unclamped = s * tiles_per_split + t
        needs_mask = (unclamped + 1) * tile_n > n_rows

        @pl.when(jnp.logical_not(needs_mask))
        def _accumulate_full():
            acc_ref[...] += ce

        @pl.when(needs_mask)
        def _accumulate_masked():
            row = jax.lax.broadcasted_iota(jnp.int32, (tile_n, 1), 0)
            valid = unclamped * tile_n + row < n_rows
            acc_ref[...] += jnp.where(valid, ce, 0.0)

        @pl.when(t == nt - 1)
        def _finalize():
            partial = jnp.sum(acc_ref[...])                   # one XLU reduce per split
            out_ref[...] = jnp.full(out_ref.shape, partial, jnp.float32)

    return kernel


def focal_loss(pre, target, gama=1.5, alpha=0.25, tile_n=None):
    """pre: (N, C) float logits (any float dtype), target: (N,) int indices."""
    n, c = pre.shape
    tgt = target.reshape(n, 1).astype(jnp.int32)

    vmem_cap = _vmem_capacity_bytes()
    tile_budget = int(0.40 * vmem_cap)                 # for bufs + working set
    vmem_limit = int(0.75 * vmem_cap)                  # Mosaic scoped-VMEM limit

    itemsize = jnp.dtype(pre.dtype).itemsize
    if tile_n is None:
        tile_n = _pick_tile_n(n, c, itemsize, tile_budget)
    else:
        # Validate user tile: full-N pass-through, else round down to x8, >= 8.
        tile_n = int(tile_n)
        if tile_n >= n:
            tile_n = n
        else:
            tile_n = max(8, (tile_n // 8) * 8)

    total_tiles = pl.cdiv(n, tile_n)
    num_splits = min(_num_tensorcores(), total_tiles)
    tiles_per_split = pl.cdiv(total_tiles, num_splits)

    if num_splits > 1:
        # Real per-core split on multi-TC chips (v7x).
        core_par = getattr(pltpu, "CORE_PARALLEL", "parallel")
        arb = getattr(pltpu, "ARBITRARY", "arbitrary")
        dim_sem = (core_par, arb)
    else:
        dim_sem = ("arbitrary", "arbitrary")

    def row_block(s, t):
        # Clamp so duplicate / out-of-range tiles of the last split never DMA
        # out of bounds; their rows are masked out inside the kernel.
        blk = jnp.minimum(s * tiles_per_split + t, total_tiles - 1)
        return (blk, 0)

    partial = pl.pallas_call(
        _make_kernel(n, tile_n, c, tiles_per_split),
        out_shape=jax.ShapeDtypeStruct((num_splits, 8, 128), jnp.float32),
        grid_spec=pltpu.PrefetchScalarGridSpec(
            num_scalar_prefetch=0,
            grid=(num_splits, tiles_per_split),
            in_specs=[
                pl.BlockSpec((tile_n, c), row_block),      # logits (native dtype)
                pl.BlockSpec((tile_n, 1), row_block),      # targets (int32)
            ],
            out_specs=pl.BlockSpec((1, 8, 128), lambda s, t: (s, 0, 0)),
            scratch_shapes=[pltpu.VMEM((tile_n, 1), jnp.float32)],
        ),
        compiler_params=pltpu.CompilerParams(
            dimension_semantics=dim_sem,
            vmem_limit_bytes=vmem_limit,
        ),
    )(pre, tgt)

    # Scalar focal epilogue (runs once, outside the per-step hot loop).
    sum_ce = jnp.sum(partial[:, 0, 0])
    logp = sum_ce / jnp.float32(n)
    p = jnp.exp(-logp)
    return (1.0 - p) ** jnp.float32(gama) * jnp.float32(alpha) * logp


def _focal_loss_ref(pre, target, gama=1.5, alpha=0.25):
    """Pure-JAX reference matching torch semantics (for correctness check)."""
    logits = pre.astype(jnp.float32)
    logprobs = jax.nn.log_softmax(logits, axis=-1)
    ce = -jnp.take_along_axis(logprobs, target[:, None].astype(jnp.int32), axis=-1)[:, 0]
    logp = jnp.mean(ce)
    p = jnp.exp(-logp)
    return (1.0 - p) ** gama * alpha * logp


if __name__ == "__main__":
    key = jax.random.PRNGKey(0)
    k1, k2, k3, k4 = jax.random.split(key, 4)

    # Case 1: small f32 shape consistent with the module (batch=8, 32 classes),
    # auto tile size (single full-dim tile).
    n1, c1 = 8, 32
    pre1 = jax.random.normal(k1, (n1, c1), dtype=jnp.float32)
    tgt1 = jax.random.randint(k2, (n1,), 0, c1, dtype=jnp.int32)
    out1 = focal_loss(pre1, tgt1, gama=1.5, alpha=0.25)
    jax.block_until_ready(out1)
    ref1 = _focal_loss_ref(pre1, tgt1, gama=1.5, alpha=0.25)
    assert jnp.allclose(out1, ref1, rtol=1e-5, atol=1e-6), (out1, ref1)

    # Case 2: bf16 logits, ragged N, explicit (non-multiple-of-8) tile override
    # -> exercises wrapper tile validation, native-dtype streaming, multi-tile
    # grid, ragged-tile masking and the interior-tile fast path.
    n2, c2 = 300, 160
    pre2 = jax.random.normal(k3, (n2, c2), dtype=jnp.bfloat16)
    tgt2 = jax.random.randint(k4, (n2,), 0, c2, dtype=jnp.int32)
    out2 = focal_loss(pre2, tgt2, gama=1.5, alpha=0.25, tile_n=60)
    jax.block_until_ready(out2)
    ref2 = _focal_loss_ref(pre2, tgt2, gama=1.5, alpha=0.25)
    assert jnp.allclose(out2, ref2, rtol=1e-4, atol=1e-5), (out2, ref2)

    print("KERNEL_OK")
</pallas_src>

<mosaic_0001>
module attributes {stable_mosaic.version = 11 : i64} {
  func.func @kernel(%arg0: i32, %arg1: i32, %arg2: memref<8x32xf32, #tpu.memory_space<vmem>>, %arg3: memref<8x1xi32, #tpu.memory_space<vmem>>, %arg4: memref<1x8x128xf32, #tpu.memory_space<vmem>>, %arg5: memref<8x1xf32, #tpu.memory_space<vmem>>) attributes {dimension_semantics = [#tpu.dimension_semantics<arbitrary>, #tpu.dimension_semantics<arbitrary>], iteration_bounds = array<i64: 1, 1>, scalar_prefetch = 0 : i64, scratch_operands = 1 : i64, tpu.core_type = #tpu.core_type<tc>, window_params = [{transform_indices = @transform_0, window_bounds = array<i64: 8, 32>}, {transform_indices = @transform_1, window_bounds = array<i64: 8, 1>}, {transform_indices = @transform_2, window_bounds = array<i64: 1, 8, 128>}]} {
    %c0_i32 = arith.constant 0 : i32
    %0 = arith.cmpi eq, %arg1, %c0_i32 : i32
    %1 = arith.extui %0 : i1 to i32
    %c0_i32_0 = arith.constant 0 : i32
    %2 = arith.cmpi ne, %1, %c0_i32_0 : i32
    scf.if %2 {
      %cst_13 = arith.constant 0.000000e+00 : f32
      %35 = vector.broadcast %cst_13 : f32 to vector<8x1xf32>
      %c0_14 = arith.constant 0 : index
      %c0_15 = arith.constant 0 : index
      %36 = vector.load %arg5[%c0_14, %c0_15] : memref<8x1xf32, #tpu.memory_space<vmem>>, vector<8x1xf32>
      tpu.vector_store %arg5[%c0_14, %c0_15], %35 {strides = array<i32>} : memref<8x1xf32, #tpu.memory_space<vmem>>, vector<8x1xf32>,
    } else {
    }
    %c0 = arith.constant 0 : index
    %c0_1 = arith.constant 0 : index
    %3 = vector.load %arg2[%c0, %c0_1] : memref<8x32xf32, #tpu.memory_space<vmem>>, vector<8x32xf32>
    %c0_2 = arith.constant 0 : index
    %c0_3 = arith.constant 0 : index
    %4 = vector.load %arg3[%c0_2, %c0_3] : memref<8x1xi32, #tpu.memory_space<vmem>>, vector<8x1xi32>
    %5 = tpu.iota {dimensions = array<i32: 1>} : vector<8x32xi32>
    %cst = arith.constant dense<0xFF800000> : vector<8xf32>
    %6 = vector.multi_reduction <maximumf>, %3, %cst [1] : vector<8x32xf32> to vector<8xf32>
    %7 = vector.shape_cast %6 : vector<8xf32> to vector<8x1xf32>
    %8 = vector.broadcast %7 : vector<8x1xf32> to vector<8x32xf32>
    %9 = arith.subf %3, %8 : vector<8x32xf32>
    %10 = math.exp %9 : vector<8x32xf32>
    %cst_4 = arith.constant dense<0.000000e+00> : vector<8xf32>
    %11 = vector.multi_reduction <add>, %10, %cst_4 [1] : vector<8x32xf32> to vector<8xf32>
    %12 = vector.shape_cast %11 : vector<8xf32> to vector<8x1xf32>
    %13 = math.log %12 : vector<8x1xf32>
    %14 = arith.addf %7, %13 : vector<8x1xf32>
    %15 = vector.broadcast %4 : vector<8x1xi32> to vector<8x32xi32>
    %16 = arith.cmpi eq, %5, %15 : vector<8x32xi32>
    %cst_5 = arith.constant 0.000000e+00 : f32
    %17 = vector.broadcast %cst_5 : f32 to vector<8x32xf32>
    %18 = arith.select %16, %3, %17 : vector<8x32xi1>, vector<8x32xf32>
    %cst_6 = arith.constant dense<0.000000e+00> : vector<8xf32>
    %19 = vector.multi_reduction <add>, %18, %cst_6 [1] : vector<8x32xf32> to vector<8xf32>
    %20 = vector.shape_cast %19 : vector<8xf32> to vector<8x1xf32>
    %21 = arith.subf %14, %20 : vector<8x1xf32>
    %c1_i32 = arith.constant 1 : i32
    %22 = arith.muli %arg0, %c1_i32 : i32
    %23 = arith.addi %22, %arg1 : i32
    %c1_i32_7 = arith.constant 1 : i32
    %24 = arith.addi %23, %c1_i32_7 : i32
    %c8_i32 = arith.constant 8 : i32
    %25 = arith.muli %24, %c8_i32 : i32
    %c8_i32_8 = arith.constant 8 : i32
    %26 = arith.cmpi sgt, %25, %c8_i32_8 : i32
    %true = arith.constant true
    %27 = arith.xori %26, %true : i1
    %28 = arith.extui %27 : i1 to i32
    %c0_i32_9 = arith.constant 0 : i32
    %29 = arith.cmpi ne, %28, %c0_i32_9 : i32
    scf.if %29 {
      %c0_13 = arith.constant 0 : index
      %c0_14 = arith.constant 0 : index
      %35 = vector.load %arg5[%c0_13, %c0_14] : memref<8x1xf32, #tpu.memory_space<vmem>>, vector<8x1xf32>
      %36 = arith.addf %35, %21 : vector<8x1xf32>
      %c0_15 = arith.constant 0 : index
      %c0_16 = arith.constant 0 : index
      %37 = vector.load %arg5[%c0_15, %c0_16] : memref<8x1xf32, #tpu.memory_space<vmem>>, vector<8x1xf32>
      tpu.vector_store %arg5[%c0_15, %c0_16], %36 {strides = array<i32>} : memref<8x1xf32, #tpu.memory_space<vmem>>, vector<8x1xf32>,
    } else {
    }
    %30 = arith.extui %26 : i1 to i32
    %c0_i32_10 = arith.constant 0 : i32
    %31 = arith.cmpi ne, %30, %c0_i32_10 : i32
    scf.if %31 {
      %35 = tpu.iota {dimensions = array<i32: 0>} : vector<8x1xi32>
      %c8_i32_13 = arith.constant 8 : i32
      %36 = arith.muli %23, %c8_i32_13 : i32
      %37 = vector.broadcast %36 : i32 to vector<8x1xi32>
      %38 = arith.addi %37, %35 : vector<8x1xi32>
      %c8_i32_14 = arith.constant 8 : i32
      %39 = vector.broadcast %c8_i32_14 : i32 to vector<8x1xi32>
      %40 = arith.cmpi slt, %38, %39 : vector<8x1xi32>
      %c0_15 = arith.constant 0 : index
      %c0_16 = arith.constant 0 : index
      %41 = vector.load %arg5[%c0_15, %c0_16] : memref<8x1xf32, #tpu.memory_space<vmem>>, vector<8x1xf32>
      %cst_17 = arith.constant 0.000000e+00 : f32
      %42 = vector.broadcast %cst_17 : f32 to vector<8x1xf32>
      %43 = arith.select %40, %21, %42 : vector<8x1xi1>, vector<8x1xf32>
      %44 = arith.addf %41, %43 : vector<8x1xf32>
      %c0_18 = arith.constant 0 : index
      %c0_19 = arith.constant 0 : index
      %45 = vector.load %arg5[%c0_18, %c0_19] : memref<8x1xf32, #tpu.memory_space<vmem>>, vector<8x1xf32>
      tpu.vector_store %arg5[%c0_18, %c0_19], %44 {strides = array<i32>} : memref<8x1xf32, #tpu.memory_space<vmem>>, vector<8x1xf32>,
    } else {
    }
    %c0_i32_11 = arith.constant 0 : i32
    %32 = arith.cmpi eq, %arg1, %c0_i32_11 : i32
    %33 = arith.extui %32 : i1 to i32
    %c0_i32_12 = arith.constant 0 : i32
    %34 = arith.cmpi ne, %33, %c0_i32_12 : i32
    scf.if %34 {
      %c0_13 = arith.constant 0 : index
      %c0_14 = arith.constant 0 : index
      %35 = vector.load %arg5[%c0_13, %c0_14] : memref<8x1xf32, #tpu.memory_space<vmem>>, vector<8x1xf32>
      %36 = vector.shape_cast %35 : vector<8x1xf32> to vector<1x8x1xf32>
      %cst_15 = arith.constant dense<0.000000e+00> : vector<1xf32>
      %37 = vector.multi_reduction <add>, %36, %cst_15 [1, 2] : vector<1x8x1xf32> to vector<1xf32>
      %38 = vector.shape_cast %37 : vector<1xf32> to vector<1x1x1xf32>
      %39 = vector.extract %38[0, 0, 0] : f32 from vector<1x1x1xf32>
      %40 = vector.broadcast %39 : f32 to vector<1x8x128xf32>
      %c0_16 = arith.constant 0 : index
      %c0_17 = arith.constant 0 : index
      %c0_18 = arith.constant 0 : index
      %41 = vector.load %arg4[%c0_16, %c0_17, %c0_18] : memref<1x8x128xf32, #tpu.memory_space<vmem>>, vector<1x8x128xf32>
      tpu.vector_store %arg4[%c0_16, %c0_17, %c0_18], %40 {strides = array<i32>} : memref<1x8x128xf32, #tpu.memory_space<vmem>>, vector<1x8x128xf32>,
    } else {
    }
    return
  }
  func.func @transform_0(%arg0: i32, %arg1: i32) -> (i32, i32) {
    %c1_i32 = arith.constant 1 : i32
    %0 = arith.muli %arg0, %c1_i32 : i32
    %1 = arith.addi %0, %arg1 : i32
    %c0_i32 = arith.constant 0 : i32
    %2 = arith.minsi %1, %c0_i32 : i32
    %c0_i32_0 = arith.constant 0 : i32
    %c0_i32_1 = arith.constant 0 : i32
    return %2, %c0_i32_0 : i32, i32
  }
  func.func @transform_1(%arg0: i32, %arg1: i32) -> (i32, i32) {
    %c1_i32 = arith.constant 1 : i32
    %0 = arith.muli %arg0, %c1_i32 : i32
    %1 = arith.addi %0, %arg1 : i32
    %c0_i32 = arith.constant 0 : i32
    %2 = arith.minsi %1, %c0_i32 : i32
    %c0_i32_0 = arith.constant 0 : i32
    %c0_i32_1 = arith.constant 0 : i32
    return %2, %c0_i32_0 : i32, i32
  }
  func.func @transform_2(%arg0: i32, %arg1: i32) -> (i32, i32, i32) {
    %c0_i32 = arith.constant 0 : i32
    %c0_i32_0 = arith.constant 0 : i32
    %c0_i32_1 = arith.constant 0 : i32
    return %arg0, %c0_i32, %c0_i32_0 : i32, i32, i32
  }
}

</mosaic_0001>

<bundles_post_ra>
// kernel: tpu_custom_call.1
= control target key start
LH: loop header
LB: loop body
LE: loop exit
PB: predicated region body
PF: predicated region fallthrough
CT: control target
= control target key end

     0   :  { %vm76_vm0 = vcmask 261120   ;;  %s240_s0 = inlined_call_operand.vmem [shape: f32[8,32], index: 0, kind: input, shape index: {}]   ;;  %s241_s1 = inlined_call_operand.vmem [shape: s32[8,1], index: 1, kind: input, shape index: {}]   ;;  %s242_s2 = inlined_call_operand.hbm [shape: f32[1,8,128], index: 2, kind: output, shape index: {}]  }
   0x1   :  { %v72_v0 = vld [vmem:[%s240_s0] sm:$0xff] }
   0x2   :  { %7 = vsyncpa [#allocation4], 0  ;;  %v77_v1 = vsel %vm76_vm0, %v72_v0, -inf  ;;  %v201_v2 = vmov 0   ;;  %v73_v3 = vld [vmem:[%s241_s1] sm:$0xff]  ;;  %v74_v7 = vlaneseq  ;;  %vm70_vm2 = vcmask 7168  }
   0x3   :  { %172 = vset.pattern.permute.xlu0 %v201_v2  ;;  %v202_v14 = vmov 0.0   ;;  %s203_s0 = smov [#allocation3]  }
   0x4   :  { %78 = vmax.xlane.f32.xlu0 %v77_v1  ;;  %v75_v8 = vand.u32 127, %v74_v7  ;;  %71 = vst.msk [vmem:[#allocation2] sm:$0xff] %vm70_vm2, %v202_v14  ;;  %s147_s1 = sshll.u32 %s203_s0, 4  ;;  %s148_s1 = int_to_ptr.vmem [resolvable:$true] %s147_s1 }
   0x5   :  { %s177_s14 = scalar_lea.vmem %s148_s1, 128  ;;  %p182_p1 = scmp.lt.s32.totalorder %s148_s1, %s148_s1 }
   0x6   :  { %p178_p0 = scmp.ne.s32.totalorder %s148_s1, %s177_s14  ;;  %p183_p2 = scmp.lt.s32.totalorder %s177_s14, %s177_s14 }
   0x8   :  { %p184_p3 = por %p183_p2, %p182_p1 }
   0xa   :  { %p185_p4 = pnand %p184_p3, %p178_p0 }
   0xb   :  { %v106_v20 = vld [vmem:[#allocation2] sm:$0xff] }
  0x1a   :  { %90 = vperm.xlu0 %172, %v73_v3  }
  0x91   :  { %v79_v4 = vpop.xlane.xlu0 %78 }
  0x92   :  { %v80_v5 = vsub.f32 %v72_v0, %v79_v4 }
  0x94   :  { %v81_v6 = vmul.f32 1.442695, %v80_v5 }
  0x96   :  { %173 = vpow2.f32 %v81_v6 }
  0x99   :  { %v91_v9 = vpop.permute.xlu0 %90 }
  0x9a   :  { %vm92_vm1 = vcmp.eq.s32.totalorder %v75_v8, %v91_v9 }
  0x9b   :  { %v93_v11 = vsel %vm92_vm1, %v72_v0, 0.0 }
  0x9c   :  { %v94_v13 = vsel %vm76_vm0, %v93_v11, 0.0 }
  0xa0   :  { %v174_v10 = vpop.eup %173 }
  0xa1   :  { %v83_v12 = vsel %vm76_vm0, %v174_v10, 0.0 }
  0xa2   :  { %84 = vadd.xlane.f32.xlu1 %v83_v12 }
  0xa6   :  { %95 = vadd.xlane.f32.xlu1 %v94_v13 }
 0x12f   :  { %v85_v15 = vpop.xlane.xlu1 %84 }
 0x130   :  { %175 = vlog2.f32 %v85_v15 }
 0x133   :  { %v96_v18 = vpop.xlane.xlu1 %95 }
 0x13a   :  { %v176_v16 = vpop.eup %175 }
 0x13b   :  { %v87_v17 = vmul.f32 0.6931472, %v176_v16 }
 0x13d   :  { %v88_v19 = vadd.f32 %v87_v17, %v79_v4 }
 0x13f   :  { %v97_v21 = vsub.f32 %v88_v19, %v96_v18 }
 0x141   :  { %v107_v22 = vadd.f32 %v106_v20, %v97_v21 }
 0x143   :  { %109 = vst.msk [vmem:[#allocation2] sm:$0xff] %vm70_vm2, %v107_v22 }
 0x14a   :  { %v127_v23 = vld [vmem:[#allocation2] sm:$0xff] }
 0x14b   :  { %v129_v24 = vsel %vm70_vm2, %v127_v23, 0.0 }
 0x14c   :  { %130 = vadd.xlane.f32.xlu1 %v129_v24 }
 0x1d9   :  { %v131_v25 = vpop.xlane.xlu1 %130 }
 0x1da   :  { %v132_v26 = vrot.slane %v131_v25, 4 }
 0x1dc   :  { %v133_v27 = vadd.f32 %v132_v26, %v131_v25 }
 0x1de   :  { %v134_v28 = vrot.slane %v133_v27, 2 }
 0x1e0   :  { %v135_v29 = vadd.f32 %v134_v28, %v133_v27 }
 0x1e2   :  { %v136_v30 = vrot.slane %v135_v29, 1 }
 0x1e4   :  { %v137_v31 = vadd.f32 %v136_v30, %v135_v29 }
 0x1e6   :  { %167 = vpush %v137_v31 }
 0x217   :  { %s168_s13 = spop %167 }
 0x218   :  { %v139_v32 = vstv %s168_s13 }
 0x219   :  { %140 = vst [vmem:[#allocation3] sm:$0xff] %v139_v32 }
 0x21a   :  { %188 = shalt.err (!%p185_p4)
}
 0x21b   :  { %s189_s17 = scalar_lea.hbm %s242_s2, 128 }
 0x21c   :  { %p190_p5 = scmp.ne.s32.totalorder %s242_s2, %s189_s17  ;;  %p193_p6 = scmp.lt.u32.totalorder %s189_s17, %s242_s2 }
 0x21e   :  { %p195_p7 = pnand %p193_p6, %p190_p5 }
 0x220   :  { %198 = shalt.err (!%p195_p7)
}
 0x221   :  { %150 = dma.vmem_to_hbm [thread:$0]  %s148_s1, 128, %s242_s2, [#allocation4]  }
 0x222   :  { %199 = dma.done.wait [#allocation4], 128  }
 0x223   :  { %200 = vsyncadd [#allocation4], 4294967168 }
 0x224   :  { %154 = vsyncpa [#allocation4], 1 }

</bundles_post_ra>
